<compile_context>
chip_gen: v7x
topology: tpu7x:2x2x1
jax: 0.10.0
libtpu: 0.0.40
codegen_flags: <defaults>
</compile_context>

<pallas_src>
import functools

import jax
import jax.numpy as jnp
from jax.experimental import pallas as pl
from jax.experimental.pallas import tpu as pltpu

GAMMA = 2.0
ALPHA = 0.25


def _round_up(x, m):
    return ((x + m - 1) // m) * m


def _cdiv(a, b):
    return -(-a // b)


def _hw_info():
    """Best-effort (per-TensorCore VMEM capacity, TensorCore count)."""
    vmem_cap = None
    cores = None
    try:
        info = pltpu.get_tpu_info()
        vmem_cap = getattr(info, "vmem_capacity_bytes", None)
        for name in ("num_cores", "core_count", "num_tensorcores",
                     "tensorcore_count", "num_tensor_cores"):
            c = getattr(info, name, None)
            if isinstance(c, int) and c > 0:
                cores = c
                break
    except Exception:
        pass
    if not vmem_cap:
        vmem_cap = 64 * 1024 * 1024   # conservative: v7x per-TC VMEM
    if not cores:
        cores = 1                     # safe default: no megacore split
    return int(vmem_cap), int(cores)


def _focal_loss_kernel(logits_ref, y_ref, out_ref, acc_ref, *,
                       n_total, tile_n, tiles_per_split):
    s = pl.program_id(0)          # partial-sum split (megacore "parallel" axis)
    i = pl.program_id(1)          # row-tile index within the split ("arbitrary")

    @pl.when(i == 0)
    def _():
        acc_ref[...] = jnp.zeros_like(acc_ref)

    row0 = (s * tiles_per_split + i) * tile_n

    # Dummy (clamped) tiles entirely past the real data contribute nothing:
    # skip their VPU/EUP work (the pipelined DMA already happened, harmless).
    @pl.when(row0 < n_total)
    def _():
        x = logits_ref[...].astype(jnp.float32)        # (TN, C), upcast in-kernel
        y = y_ref[...]                                 # (TN, 1) int32

        # per-row cross entropy: logsumexp(x) - x[y], computed on x - max(x)
        m = jnp.max(x, axis=-1, keepdims=True)                         # (TN, 1)
        xm = x - m
        e = jnp.exp(xm)
        sum_e = jnp.sum(e, axis=-1, keepdims=True)                     # (TN, 1)

        cls = jax.lax.broadcasted_iota(jnp.int32, (1, x.shape[1]), 1)  # (1, C)
        picked = jnp.sum(jnp.where(cls == y, xm, 0.0),
                         axis=-1, keepdims=True)                       # x[y]-m
        ce = jnp.log(sum_e) - picked                                   # (TN, 1)

        # focal weighting; gamma == 2 -> explicit square (VPU-only, exact)
        pt = jnp.exp(-ce)
        w = 1.0 - pt
        f_loss = ALPHA * (w * w) * ce                                  # (TN, 1)

        # select-mask rows beyond the real data (partial last block / dummies)
        rows = row0 + jax.lax.broadcasted_iota(jnp.int32, (tile_n, 1), 0)
        acc_ref[...] += jnp.where(rows < n_total, f_loss, 0.0)

    @pl.when(i == tiles_per_split - 1)
    def _():
        out_ref[0, 0] = jnp.sum(acc_ref[...])


def focal_loss(logits, y, *, reduction="mean", tile_n=None, num_splits=None):
    """logits: (N, C) float, y: (N,) int class indices. Returns scalar loss.

    Note: out-of-range targets (y < 0 or y >= C) are not checked; they yield
    picked = 0 and an over-large CE (finite), same as the reference kernel.
    Alpha is applied flat (exactly as the PyTorch module: alpha*(1-pt)^g*CE).
    """
    n, n_classes = logits.shape
    itemsize = jnp.dtype(logits.dtype).itemsize
    lane_c = _round_up(n_classes, 128)            # true lane-padded width
    sub_mult = max(8, 32 // itemsize)             # 8 f32 / 16 bf16 / 32 int8

    vmem_cap, cores = _hw_info()
    vmem_limit_target = min(vmem_cap // 2, 64 * 1024 * 1024)
    tile_budget = vmem_limit_target // 2

    # per-row VMEM bytes: double-buffered logits tile + double-buffered
    # lane-padded int32 target column + single-buffered f32 accumulator column
    per_row = 2 * (lane_c * itemsize + 128 * 4) + 128 * 4

    if tile_n is None:
        tile_n = tile_budget // per_row
        tile_n = max(sub_mult, min(4096, (tile_n // sub_mult) * sub_mult))
    tile_n = min(_round_up(tile_n, sub_mult), _round_up(n, sub_mult))

    n_tiles = _cdiv(n, tile_n)
    if num_splits is None:
        num_splits = 2 if (cores >= 2 and n_tiles >= 4) else 1
    num_splits = max(1, min(num_splits, n_tiles))
    tiles_per_split = _cdiv(n_tiles, num_splits)
    last_block = n_tiles - 1

    # Free reshape; no padding / no copy of logits or targets in HBM.
    y2 = y.astype(jnp.int32).reshape(n, 1)

    footprint = tile_n * per_row
    vmem_limit = int(min(vmem_limit_target, footprint + 16 * 1024 * 1024))

    kernel = functools.partial(
        _focal_loss_kernel,
        n_total=n, tile_n=tile_n, tiles_per_split=tiles_per_split)

    def row_block_map(s, i, tps=tiles_per_split, last=last_block):
        # Clamp dummy logical tiles to the last real block; the in-kernel row
        # mask zeroes their contribution.
        return (jnp.minimum(s * tps + i, last), 0)

    cost = pl.CostEstimate(
        flops=6 * n * n_classes,
        transcendentals=n * n_classes + 2 * n,
        bytes_accessed=n * n_classes * itemsize + n * 4 + num_splits * 4)

    partials = pl.pallas_call(
        kernel,
        out_shape=jax.ShapeDtypeStruct((num_splits, 1), jnp.float32),
        grid_spec=pltpu.PrefetchScalarGridSpec(
            num_scalar_prefetch=0,
            grid=(num_splits, tiles_per_split),
            in_specs=[
                pl.BlockSpec((tile_n, n_classes), row_block_map),
                pl.BlockSpec((tile_n, 1), row_block_map),
            ],
            out_specs=pl.BlockSpec((1, 1), lambda s, i: (s, 0),
                                   memory_space=pltpu.SMEM),
            scratch_shapes=[pltpu.VMEM((tile_n, 1), jnp.float32)],
        ),
        compiler_params=pltpu.CompilerParams(
            dimension_semantics=("parallel", "arbitrary"),
            vmem_limit_bytes=vmem_limit,
        ),
        cost_estimate=cost,
    )(logits, y2)

    total = jnp.sum(partials)
    if reduction == "mean":
        return total / jnp.float32(n)
    elif reduction == "sum":
        return total
    else:
        # TODO(synk): reduction='none' (per-row losses) needs a per-row VMEM output path.
        raise NotImplementedError("reduction must be 'mean' or 'sum'")


if __name__ == "__main__":
    key = jax.random.PRNGKey(0)
    k1, k2, k3, k4 = jax.random.split(key, 4)

    def ref_focal(lg, yy):
        lg = lg.astype(jnp.float32)
        lse = jax.nn.logsumexp(lg, axis=-1)
        ce = lse - jnp.take_along_axis(lg, yy[:, None], axis=-1)[:, 0]
        pt = jnp.exp(-ce)
        return jnp.mean(ALPHA * (1.0 - pt) ** GAMMA * ce)

    # small shapes consistent with the module's forward: (batch, classes) + targets
    N, C = 16, 16
    logits = jax.random.normal(k1, (N, C), dtype=jnp.float32)
    y = jax.random.randint(k2, (N,), 0, C, dtype=jnp.int32)
    loss = jax.block_until_ready(focal_loss(logits, y))
    assert jnp.allclose(loss, ref_focal(logits, y), rtol=1e-5, atol=1e-6), (
        loss, ref_focal(logits, y))

    # second case exercises the partial last tile + clamped dummy-tile path
    N2, C2 = 37, 10
    logits2 = jax.random.normal(k3, (N2, C2), dtype=jnp.float32)
    y2 = jax.random.randint(k4, (N2,), 0, C2, dtype=jnp.int32)
    loss2 = jax.block_until_ready(focal_loss(logits2, y2, tile_n=8))
    assert jnp.allclose(loss2, ref_focal(logits2, y2), rtol=1e-5, atol=1e-6), (
        loss2, ref_focal(logits2, y2))

    # third case forces the 2-way split with dummy clamped tiles regardless of
    # detected core count (correct on single-TC chips too: splits run serially)
    loss3 = jax.block_until_ready(focal_loss(logits2, y2, tile_n=8, num_splits=2))
    assert jnp.allclose(loss3, ref_focal(logits2, y2), rtol=1e-5, atol=1e-6), (
        loss3, ref_focal(logits2, y2))

    print("KERNEL_OK")
</pallas_src>

<mosaic_0001>
module attributes {stable_mosaic.version = 11 : i64} {
  func.func @_focal_loss_kernel(%arg0: i32, %arg1: i32, %arg2: memref<16x16xf32, #tpu.memory_space<vmem>>, %arg3: memref<16x1xi32, #tpu.memory_space<vmem>>, %arg4: memref<1x1xf32, #tpu.memory_space<smem>>, %arg5: memref<16x1xf32, #tpu.memory_space<vmem>>) attributes {dimension_semantics = [#tpu.dimension_semantics<parallel>, #tpu.dimension_semantics<arbitrary>], iteration_bounds = array<i64: 1, 1>, scalar_prefetch = 0 : i64, scratch_operands = 1 : i64, tpu.core_type = #tpu.core_type<tc>, window_params = [{transform_indices = @transform_0, window_bounds = array<i64: 16, 16>}, {transform_indices = @transform_1, window_bounds = array<i64: 16, 1>}, {transform_indices = @transform_2, window_bounds = array<i64: 1, 1>}]} {
    %c0_i32 = arith.constant 0 : i32
    %0 = arith.cmpi eq, %arg1, %c0_i32 : i32
    %1 = arith.extui %0 : i1 to i32
    %c0_i32_0 = arith.constant 0 : i32
    %2 = arith.cmpi ne, %1, %c0_i32_0 : i32
    scf.if %2 {
      %cst = arith.constant 0.000000e+00 : f32
      %12 = vector.broadcast %cst : f32 to vector<16x1xf32>
      %c0 = arith.constant 0 : index
      %c0_5 = arith.constant 0 : index
      %13 = vector.load %arg5[%c0, %c0_5] : memref<16x1xf32, #tpu.memory_space<vmem>>, vector<16x1xf32>
      tpu.vector_store %arg5[%c0, %c0_5], %12 {strides = array<i32>} : memref<16x1xf32, #tpu.memory_space<vmem>>, vector<16x1xf32>,
    } else {
    }
    %c1_i32 = arith.constant 1 : i32
    %3 = arith.muli %arg0, %c1_i32 : i32
    %4 = arith.addi %3, %arg1 : i32
    %c16_i32 = arith.constant 16 : i32
    %5 = arith.muli %4, %c16_i32 : i32
    %c16_i32_1 = arith.constant 16 : i32
    %6 = arith.cmpi slt, %5, %c16_i32_1 : i32
    %7 = arith.extui %6 : i1 to i32
    %c0_i32_2 = arith.constant 0 : i32
    %8 = arith.cmpi ne, %7, %c0_i32_2 : i32
    scf.if %8 {
      %c0 = arith.constant 0 : index
      %c0_5 = arith.constant 0 : index
      %12 = vector.load %arg2[%c0, %c0_5] : memref<16x16xf32, #tpu.memory_space<vmem>>, vector<16x16xf32>
      %c0_6 = arith.constant 0 : index
      %c0_7 = arith.constant 0 : index
      %13 = vector.load %arg3[%c0_6, %c0_7] : memref<16x1xi32, #tpu.memory_space<vmem>>, vector<16x1xi32>
      %cst = arith.constant dense<0xFF800000> : vector<16xf32>
      %14 = vector.multi_reduction <maximumf>, %12, %cst [1] : vector<16x16xf32> to vector<16xf32>
      %15 = vector.shape_cast %14 : vector<16xf32> to vector<16x1xf32>
      %16 = vector.broadcast %15 : vector<16x1xf32> to vector<16x16xf32>
      %17 = arith.subf %12, %16 : vector<16x16xf32>
      %18 = math.exp %17 : vector<16x16xf32>
      %cst_8 = arith.constant dense<0.000000e+00> : vector<16xf32>
      %19 = vector.multi_reduction <add>, %18, %cst_8 [1] : vector<16x16xf32> to vector<16xf32>
      %20 = vector.shape_cast %19 : vector<16xf32> to vector<16x1xf32>
      %21 = tpu.iota {dimensions = array<i32: 1>} : vector<1x16xi32>
      %22 = vector.broadcast %21 : vector<1x16xi32> to vector<16x16xi32>
      %23 = vector.broadcast %13 : vector<16x1xi32> to vector<16x16xi32>
      %24 = arith.cmpi eq, %22, %23 : vector<16x16xi32>
      %cst_9 = arith.constant 0.000000e+00 : f32
      %25 = vector.broadcast %cst_9 : f32 to vector<16x16xf32>
      %26 = arith.select %24, %17, %25 : vector<16x16xi1>, vector<16x16xf32>
      %cst_10 = arith.constant dense<0.000000e+00> : vector<16xf32>
      %27 = vector.multi_reduction <add>, %26, %cst_10 [1] : vector<16x16xf32> to vector<16xf32>
      %28 = vector.shape_cast %27 : vector<16xf32> to vector<16x1xf32>
      %29 = math.log %20 : vector<16x1xf32>
      %30 = arith.subf %29, %28 : vector<16x1xf32>
      %cst_11 = arith.constant 0.000000e+00 : f32
      %31 = vector.broadcast %cst_11 : f32 to vector<16x1xf32>
      %32 = arith.subf %31, %30 : vector<16x1xf32>
      %33 = math.exp %32 : vector<16x1xf32>
      %cst_12 = arith.constant 1.000000e+00 : f32
      %34 = vector.broadcast %cst_12 : f32 to vector<16x1xf32>
      %35 = arith.subf %34, %33 : vector<16x1xf32>
      %36 = arith.mulf %35, %35 : vector<16x1xf32>
      %cst_13 = arith.constant 2.500000e-01 : f32
      %37 = vector.broadcast %cst_13 : f32 to vector<16x1xf32>
      %38 = arith.mulf %37, %36 : vector<16x1xf32>
      %39 = arith.mulf %38, %30 : vector<16x1xf32>
      %40 = tpu.iota {dimensions = array<i32: 0>} : vector<16x1xi32>
      %41 = vector.broadcast %5 : i32 to vector<16x1xi32>
      %42 = arith.addi %41, %40 : vector<16x1xi32>
      %c0_14 = arith.constant 0 : index
      %c0_15 = arith.constant 0 : index
      %43 = vector.load %arg5[%c0_14, %c0_15] : memref<16x1xf32, #tpu.memory_space<vmem>>, vector<16x1xf32>
      %c16_i32_16 = arith.constant 16 : i32
      %44 = vector.broadcast %c16_i32_16 : i32 to vector<16x1xi32>
      %45 = arith.cmpi slt, %42, %44 : vector<16x1xi32>
      %cst_17 = arith.constant 0.000000e+00 : f32
      %46 = vector.broadcast %cst_17 : f32 to vector<16x1xf32>
      %47 = arith.select %45, %39, %46 : vector<16x1xi1>, vector<16x1xf32>
      %48 = arith.addf %43, %47 : vector<16x1xf32>
      %c0_18 = arith.constant 0 : index
      %c0_19 = arith.constant 0 : index
      %49 = vector.load %arg5[%c0_18, %c0_19] : memref<16x1xf32, #tpu.memory_space<vmem>>, vector<16x1xf32>
      tpu.vector_store %arg5[%c0_18, %c0_19], %48 {strides = array<i32>} : memref<16x1xf32, #tpu.memory_space<vmem>>, vector<16x1xf32>,
    } else {
    }
    %c0_i32_3 = arith.constant 0 : i32
    %9 = arith.cmpi eq, %arg1, %c0_i32_3 : i32
    %10 = arith.extui %9 : i1 to i32
    %c0_i32_4 = arith.constant 0 : i32
    %11 = arith.cmpi ne, %10, %c0_i32_4 : i32
    scf.if %11 {
      %c0 = arith.constant 0 : index
      %c0_5 = arith.constant 0 : index
      %12 = vector.load %arg5[%c0, %c0_5] : memref<16x1xf32, #tpu.memory_space<vmem>>, vector<16x1xf32>
      %13 = vector.shape_cast %12 : vector<16x1xf32> to vector<1x16x1xf32>
      %cst = arith.constant dense<0.000000e+00> : vector<1xf32>
      %14 = vector.multi_reduction <add>, %13, %cst [1, 2] : vector<1x16x1xf32> to vector<1xf32>
      %15 = vector.shape_cast %14 : vector<1xf32> to vector<1x1x1xf32>
      %16 = vector.extract %15[0, 0, 0] : f32 from vector<1x1x1xf32>
      %c0_6 = arith.constant 0 : index
      %c0_7 = arith.constant 0 : index
      %17 = memref.load %arg4[%c0_6, %c0_7] : memref<1x1xf32, #tpu.memory_space<smem>>
      memref.store %16, %arg4[%c0_6, %c0_7] : memref<1x1xf32, #tpu.memory_space<smem>>
    } else {
    }
    return
  }
  func.func @transform_0(%arg0: i32, %arg1: i32) -> (i32, i32) {
    %c1_i32 = arith.constant 1 : i32
    %0 = arith.muli %arg0, %c1_i32 : i32
    %1 = arith.addi %0, %arg1 : i32
    %c0_i32 = arith.constant 0 : i32
    %2 = arith.minsi %1, %c0_i32 : i32
    %c0_i32_0 = arith.constant 0 : i32
    %c0_i32_1 = arith.constant 0 : i32
    return %2, %c0_i32_0 : i32, i32
  }
  func.func @transform_1(%arg0: i32, %arg1: i32) -> (i32, i32) {
    %c1_i32 = arith.constant 1 : i32
    %0 = arith.muli %arg0, %c1_i32 : i32
    %1 = arith.addi %0, %arg1 : i32
    %c0_i32 = arith.constant 0 : i32
    %2 = arith.minsi %1, %c0_i32 : i32
    %c0_i32_0 = arith.constant 0 : i32
    %c0_i32_1 = arith.constant 0 : i32
    return %2, %c0_i32_0 : i32, i32
  }
  func.func @transform_2(%arg0: i32, %arg1: i32) -> (i32, i32) {
    %c0_i32 = arith.constant 0 : i32
    %c0_i32_0 = arith.constant 0 : i32
    return %arg0, %c0_i32 : i32, i32
  }
}

</mosaic_0001>

<bundles_post_ra>
// kernel: tpu_custom_call.1
= control target key start
LH: loop header
LB: loop body
LE: loop exit
PB: predicated region body
PF: predicated region fallthrough
CT: control target
= control target key end

     0   :  { %vm93_vm0 = vcmask 130048   ;;  %v243_v4 = vmov 0   ;;  %s297_s0 = inlined_call_operand.vmem [shape: f32[16,16], index: 0, kind: input, shape index: {}]   ;;  %s298_s1 = inlined_call_operand.vmem [shape: s32[16,1], index: 1, kind: input, shape index: {}]   ;;  %s299_s2 = inlined_call_operand.hbm [shape: f32[1,1], index: 2, kind: output, shape index: {}]  }
   0x1   :  { %v89_v0 = vld [vmem:[%s297_s0] sm:$0xff]  ;;  %v90_v1 = vld [vmem:[%s297_s0 + $0x8] sm:$0xff]  ;;  %217 = vset.pattern.permute.xlu1 %v243_v4  ;;  %218 = vset.pattern.permute.xlu0 %v243_v4 }
   0x2   :  { %v91_v2 = vld [vmem:[%s298_s1] sm:$0xff]  ;;  %v94_v3 = vsel %vm93_vm0, %v89_v0, -inf }
   0x3   :  { %7 = vsyncpa [#allocation4], 0  ;;  %95 = vmax.xlane.f32.xlu0 %v94_v3  ;;  %115 = vperm.xlu1 %217, %v91_v2   ;;  %v97_v5 = vsel %vm93_vm0, %v90_v1, -inf  ;;  %v92_v6 = vld [vmem:[%s298_s1 + $0x8] sm:$0xff]  ;;  %v112_v12 = vlaneseq  ;;  %vm80_vm3 = vcmask 7168   ;;  %v244_v25 = vmov 0.0  }
   0x4   :  { %81 = vst.msk [vmem:[#allocation2] sm:$0xff] %vm80_vm3, %v244_v25  ;;  %82 = vst.msk [vmem:[#allocation2 + $0x8] sm:$0xff] %vm80_vm3, %v244_v25  ;;  %s231_s18 = scalar_lea.hbm %s299_s2, 16 }
   0x5   :  { %v113_v15 = vand.u32 127, %v112_v12  ;;  %p232_p0 = scmp.ne.s32.totalorder %s299_s2, %s231_s18  ;;  %p235_p1 = scmp.lt.u32.totalorder %s231_s18, %s299_s2 }
   0x7   :  { %98 = vmax.xlane.f32.xlu0 %v97_v5  ;;  %118 = vperm.xlu1 %217, %v92_v6   ;;  %p237_p2 = pnand %p235_p1, %p232_p0 }
   0xb   :  { %v156_v46 = vld [vmem:[#allocation2] sm:$0xff]  ;;  %v157_v51 = vld [vmem:[#allocation2 + $0x8] sm:$0xff] }
  0x82   :  { %v116_v14 = vpop.permute.xlu1 %115 }
  0x83   :  { %vm120_vm1 = vcmp.eq.s32.totalorder %v113_v15, %v116_v14 }
  0x86   :  { %v119_v17 = vpop.permute.xlu1 %118 }
  0x87   :  { %vm121_vm2 = vcmp.eq.s32.totalorder %v113_v15, %v119_v17 }
  0x90   :  { %v96_v7 = vpop.xlane.xlu0 %95 }
  0x91   :  { %v100_v8 = vsub.f32 %v89_v0, %v96_v7 }
  0x93   :  { %v102_v9 = vmul.f32 1.442695, %v100_v8  ;;  %v122_v19 = vsel %vm120_vm1, %v100_v8, 0.0 }
  0x94   :  { %v99_v10 = vpop.xlane.xlu0 %98  ;;  %v124_v21 = vsel %vm93_vm0, %v122_v19, 0.0 }
  0x95   :  { %219 = vpow2.f32 %v102_v9  ;;  %v101_v11 = vsub.f32 %v90_v1, %v99_v10 }
  0x97   :  { %v104_v13 = vmul.f32 1.442695, %v101_v11  ;;  %v123_v23 = vsel %vm121_vm2, %v101_v11, 0.0 }
  0x98   :  { %v127_v24 = vsel %vm93_vm0, %v123_v23, 0.0 }
  0x99   :  { %221 = vpow2.f32 %v104_v13 }
  0x9f   :  { %v220_v16 = vpop.eup %219 }
  0xa0   :  { %v106_v18 = vsel %vm93_vm0, %v220_v16, 0.0 }
  0xa1   :  { %107 = vadd.xlane.f32.xlu0 %v106_v18 }
  0xa3   :  { %v222_v20 = vpop.eup %221 }
  0xa4   :  { %v109_v22 = vsel %vm93_vm0, %v222_v20, 0.0 }
  0xa5   :  { %125 = vadd.xlane.f32.xlu0 %v124_v21  ;;  %110 = vadd.xlane.f32.xlu1 %v109_v22 }
  0xa9   :  { %128 = vadd.xlane.f32.xlu0 %v127_v24 }
 0x12e   :  { %v108_v26 = vpop.xlane.xlu0 %107 }
 0x12f   :  { %223 = vlog2.f32 %v108_v26 }
 0x132   :  { %v111_v27 = vpop.xlane.xlu1 %110  ;;  %v126_v29 = vpop.xlane.xlu0 %125 }
 0x133   :  { %225 = vlog2.f32 %v111_v27 }
 0x136   :  { %v129_v35 = vpop.xlane.xlu0 %128 }
 0x139   :  { %v224_v28 = vpop.eup %223 }
 0x13a   :  { %v131_v30 = vmul.f32 0.6931472, %v224_v28 }
 0x13c   :  { %v134_v31 = vsub.f32 %v131_v30, %v126_v29 }
 0x13d   :  { %v226_v32 = vpop.eup %225 }
 0x13e   :  { %v136_v33 = vsub.f32 0.0, %v134_v31  ;;  %v133_v34 = vmul.f32 0.6931472, %v226_v32 }
 0x140   :  { %v138_v36 = vmul.f32 1.442695, %v136_v33  ;;  %v135_v37 = vsub.f32 %v133_v34, %v129_v35 }
 0x142   :  { %227 = vpow2.f32 %v138_v36  ;;  %v137_v38 = vsub.f32 0.0, %v135_v37 }
 0x144   :  { %v140_v39 = vmul.f32 1.442695, %v137_v38 }
 0x146   :  { %229 = vpow2.f32 %v140_v39 }
 0x14c   :  { %v228_v40 = vpop.eup %227 }
 0x14d   :  { %v142_v41 = vsub.f32 1.0, %v228_v40 }
 0x14f   :  { %v144_v42 = vmul.f32 %v142_v41, %v142_v41 }
 0x150   :  { %v230_v43 = vpop.eup %229 }
 0x151   :  { %v146_v44 = vmul.f32 0.25, %v144_v42  ;;  %v143_v45 = vsub.f32 1.0, %v230_v43 }
 0x153   :  { %v148_v47 = vmul.f32 %v146_v44, %v134_v31  ;;  %v145_v48 = vmul.f32 %v143_v45, %v143_v45 }
 0x155   :  { %v162_v49 = vadd.f32 %v156_v46, %v148_v47  ;;  %v147_v50 = vmul.f32 0.25, %v145_v48 }
 0x157   :  { %165 = vst.msk [vmem:[#allocation2] sm:$0xff] %vm80_vm3, %v162_v49  ;;  %v149_v52 = vmul.f32 %v147_v50, %v135_v37 }
 0x159   :  { %v163_v53 = vadd.f32 %v157_v51, %v149_v52 }
 0x15b   :  { %166 = vst.msk [vmem:[#allocation2 + $0x8] sm:$0xff] %vm80_vm3, %v163_v53 }
 0x15e   :  { %v170_v54 = vld [vmem:[#allocation2] sm:$0xff] }
 0x15f   :  { %v173_v56 = vsel %vm80_vm3, %v170_v54, 0.0 }
 0x162   :  { %v171_v55 = vld [vmem:[#allocation2 + $0x8] sm:$0xff] }
 0x163   :  { %v174_v57 = vsel %vm80_vm3, %v171_v55, 0.0 }
 0x164   :  { %v175_v58 = vadd.f32 %v174_v57, %v173_v56 }
 0x166   :  { %176 = vadd.xlane.f32.xlu0 %v175_v58 }
 0x1f3   :  { %v177_v59 = vpop.xlane.xlu0 %176 }
 0x1f4   :  { %v178_v60 = vrot.slane %v177_v59, 4 }
 0x1f6   :  { %v179_v61 = vadd.f32 %v178_v60, %v177_v59 }
 0x1f8   :  { %v180_v62 = vrot.slane %v179_v61, 2 }
 0x1fa   :  { %v181_v63 = vadd.f32 %v180_v62, %v179_v61 }
 0x1fc   :  { %v182_v0 = vrot.slane %v181_v63, 1 }
 0x1fe   :  { %v183_v1 = vadd.f32 %v182_v0, %v181_v63 }
 0x200   :  { %212 = vpush %v183_v1 }
 0x231   :  { %s213_s0 = spop %212 }
 0x232   :  { %186 = sst [smem:[#allocation3]] %s213_s0 }
 0x233   :  { %240 = shalt.err (!%p237_p2)
}
 0x234   :  { %s245_s23 = smov [#allocation3]  }
 0x235   :  { %194 = dma.smem_to_hbm %s245_s23, 16, %s299_s2, [#allocation4]  }
 0x236   :  { %241 = dma.done.wait [#allocation4], 16  }
 0x237   :  { %242 = vsyncadd [#allocation4], 4294967280 }
 0x238   :  { %198 = sfence }
 0x239   :  { %199 = vsyncpa [#allocation4], 1 }

</bundles_post_ra>
